<compile_context>
chip_gen: v5e
topology: v5e:2x2
jax: 0.10.0
libtpu: 0.0.40
codegen_flags: <defaults>
</compile_context>

<pallas_src>
import math

import jax
import jax.numpy as jnp
from jax.experimental import pallas as pl
from jax.experimental.pallas import tpu as pltpu


def _round_up(n: int, m: int) -> int:
    return ((n + m - 1) // m) * m


def _tokenizer_bias_kernel(x_ref, w_ref, b_ref, o_ref):
    # x_ref: (TB, F)   w_ref/b_ref: (F, D)   o_ref: (TB, F, D)
    x = x_ref[...].astype(jnp.float32)
    w = w_ref[...].astype(jnp.float32)
    b = b_ref[...].astype(jnp.float32)
    # In-kernel expand + lane-splat of x along D; VPU mul+add in f32.
    o_ref[...] = (x[:, :, None] * w[None, :, :] + b[None, :, :]).astype(o_ref.dtype)


def _tokenizer_nobias_kernel(x_ref, w_ref, o_ref):
    x = x_ref[...].astype(jnp.float32)
    w = w_ref[...].astype(jnp.float32)
    o_ref[...] = (x[:, :, None] * w[None, :, :]).astype(o_ref.dtype)


def numerical_feature_tokenizer(x, weight, bias=None, *, tb=None, out_dtype=None):
    """NumericalFeatureTokenizer.forward.

    x: (B, F) floats; weight: (F, D); bias: (F, D) or None.
    Returns (B, F, D) in `out_dtype` (default: x.dtype).
    """
    B, F = x.shape
    F_w, D = weight.shape
    assert F == F_w, "x feature dim must match weight rows"
    if bias is not None:
        assert bias.shape == (F, D)

    out_dtype = x.dtype if out_dtype is None else jnp.dtype(out_dtype)
    out_bytes = jnp.dtype(out_dtype).itemsize

    # --- real (padded) per-row VMEM footprints: sublanes -> 8, lanes -> 128.
    Fp_sub = _round_up(F, 8)
    Dp_lane = _round_up(D, 128)
    out_row_bytes = Fp_sub * Dp_lane * out_bytes                # per batch row of out tile
    x_row_bytes = _round_up(F, 128) * x.dtype.itemsize          # per batch row of x tile
    wb_tile_bytes = Fp_sub * Dp_lane * weight.dtype.itemsize    # resident weight/bias tile

    # --- batch tile: target ~8 MiB of output per grid step, tb % 8 == 0.
    if tb is None:
        target_tile_bytes = 8 << 20
        tb = target_tile_bytes // max(out_row_bytes, 1)
        tb = max(8, min(4096, (tb // 8) * 8))
    tb = int(min(tb, max(B, 1)))
    if tb >= B:
        # Whole batch fits in one step.  If it is large enough to matter,
        # split into two blocks so the parallel axis can use both v7x TCs.
        if B >= 16 and B * out_row_bytes >= (4 << 20):
            tb = max(8, _round_up((B + 1) // 2, 8))
        else:
            tb = B  # full-dim block (exempt from the %8 rule)
    if tb < B:
        assert tb % 8 == 0, "batch tile must be a multiple of 8 (or cover the batch)"
    grid = (pl.cdiv(B, tb),)  # partial last block is clipped by the pipeline

    # --- VMEM budget from the real padded tile footprints.
    out_tile_bytes = tb * out_row_bytes
    x_tile_bytes = _round_up(tb, 8) * x_row_bytes
    n_wb = 2 if bias is not None else 1
    vmem_bytes = 2 * (out_tile_bytes + x_tile_bytes) + 2 * n_wb * wb_tile_bytes + (2 << 20)
    vmem_bytes = int(min(max(vmem_bytes, 16 << 20), 48 << 20))  # safe on v5e..v7x

    x_spec = pl.BlockSpec((tb, F), lambda i: (i, 0))
    wb_spec = pl.BlockSpec((F, D), lambda i: (0, 0))          # grid-invariant: one DMA
    out_spec = pl.BlockSpec((tb, F, D), lambda i: (i, 0, 0))  # true shape, lane-dense

    if bias is not None:
        kernel = _tokenizer_bias_kernel
        in_specs = [x_spec, wb_spec, wb_spec]
        args = (x, weight, bias)
    else:
        kernel = _tokenizer_nobias_kernel
        in_specs = [x_spec, wb_spec]
        args = (x, weight)

    flops = (2 if bias is not None else 1) * B * F * D
    bytes_accessed = (
        x.size * x.dtype.itemsize
        + weight.size * weight.dtype.itemsize
        + (bias.size * bias.dtype.itemsize if bias is not None else 0)
        + B * F * D * out_bytes
    )

    return pl.pallas_call(
        kernel,
        out_shape=jax.ShapeDtypeStruct((B, F, D), out_dtype),
        grid_spec=pltpu.PrefetchScalarGridSpec(
            num_scalar_prefetch=0,
            grid=grid,
            in_specs=in_specs,
            out_specs=out_spec,
        ),
        compiler_params=pltpu.CompilerParams(
            dimension_semantics=("parallel",),
            vmem_limit_bytes=vmem_bytes,
        ),
        cost_estimate=pl.CostEstimate(
            flops=flops, transcendentals=0, bytes_accessed=bytes_accessed
        ),
    )(*args)


if __name__ == "__main__":
    key = jax.random.PRNGKey(0)

    def make_inputs(n_features, d_token, batch, with_bias, k):
        kx, kw, kb = jax.random.split(k, 3)
        # 'uniform' initialization scheme: Uniform(-s, s) with s = d_token ** -0.5
        s = 1.0 / math.sqrt(d_token)
        weight = jax.random.uniform(kw, (n_features, d_token), jnp.float32, -s, s)
        bias = (
            jax.random.uniform(kb, (n_features, d_token), jnp.float32, -s, s)
            if with_bias
            else None
        )
        x = jax.random.normal(kx, (batch, n_features), jnp.float32)
        return x, weight, bias

    checks = [
        # (B, F, D, bias, tb)
        (8, 8, 128, True, None),   # aligned shapes, bias path
        (12, 8, 96, False, None),  # D % 128 != 0 and B % 8 != 0 -> no pad/slice path
        (20, 8, 128, True, 8),     # forced small tile -> partial last batch block
    ]
    keys = jax.random.split(key, len(checks))
    for (B, F, D, with_bias, tb), k in zip(checks, keys):
        x, weight, bias = make_inputs(F, D, B, with_bias, k)
        out = numerical_feature_tokenizer(x, weight, bias, tb=tb)
        out = jax.block_until_ready(out)

        # Pure-JAX reference (f32 output path -> tight tolerance).
        ref = weight[None] * x[..., None]
        if bias is not None:
            ref = ref + bias[None]
        assert out.shape == (B, F, D), (out.shape, (B, F, D))
        assert out.dtype == x.dtype
        assert jnp.allclose(out, ref, atol=1e-6, rtol=1e-6), (B, F, D, with_bias, tb)

    print("KERNEL_OK")
</pallas_src>

<mosaic_0001>
module attributes {stable_mosaic.version = 11 : i64} {
  func.func @_tokenizer_bias_kernel(%arg0: i32, %arg1: memref<8x8xf32, #tpu.memory_space<vmem>>, %arg2: memref<8x128xf32, #tpu.memory_space<vmem>>, %arg3: memref<8x128xf32, #tpu.memory_space<vmem>>, %arg4: memref<8x8x128xf32, #tpu.memory_space<vmem>>) attributes {dimension_semantics = [#tpu.dimension_semantics<parallel>], iteration_bounds = array<i64: 1>, scalar_prefetch = 0 : i64, scratch_operands = 0 : i64, tpu.core_type = #tpu.core_type<tc>, window_params = [{transform_indices = @transform_0, window_bounds = array<i64: 8, 8>}, {pipeline_mode = #tpu.pipeline_mode<synchronous>, transform_indices = @transform_1, window_bounds = array<i64: 8, 128>}, {pipeline_mode = #tpu.pipeline_mode<synchronous>, transform_indices = @transform_2, window_bounds = array<i64: 8, 128>}, {transform_indices = @transform_3, window_bounds = array<i64: 8, 8, 128>}]} {
    %c0 = arith.constant 0 : index
    %c0_0 = arith.constant 0 : index
    %0 = vector.load %arg1[%c0, %c0_0] : memref<8x8xf32, #tpu.memory_space<vmem>>, vector<8x8xf32>
    %c0_1 = arith.constant 0 : index
    %c0_2 = arith.constant 0 : index
    %1 = vector.load %arg2[%c0_1, %c0_2] : memref<8x128xf32, #tpu.memory_space<vmem>>, vector<8x128xf32>
    %c0_3 = arith.constant 0 : index
    %c0_4 = arith.constant 0 : index
    %2 = vector.load %arg3[%c0_3, %c0_4] : memref<8x128xf32, #tpu.memory_space<vmem>>, vector<8x128xf32>
    %3 = vector.shape_cast %0 : vector<8x8xf32> to vector<8x8x1xf32>
    %4 = vector.shape_cast %1 : vector<8x128xf32> to vector<1x8x128xf32>
    %5 = vector.broadcast %3 : vector<8x8x1xf32> to vector<8x8x128xf32>
    %6 = vector.broadcast %4 : vector<1x8x128xf32> to vector<8x8x128xf32>
    %7 = arith.mulf %5, %6 : vector<8x8x128xf32>
    %8 = vector.shape_cast %2 : vector<8x128xf32> to vector<1x8x128xf32>
    %9 = vector.broadcast %8 : vector<1x8x128xf32> to vector<8x8x128xf32>
    %10 = arith.addf %7, %9 : vector<8x8x128xf32>
    %c0_5 = arith.constant 0 : index
    %c0_6 = arith.constant 0 : index
    %c0_7 = arith.constant 0 : index
    %11 = vector.load %arg4[%c0_5, %c0_6, %c0_7] : memref<8x8x128xf32, #tpu.memory_space<vmem>>, vector<8x8x128xf32>
    tpu.vector_store %arg4[%c0_5, %c0_6, %c0_7], %10 {strides = array<i32>} : memref<8x8x128xf32, #tpu.memory_space<vmem>>, vector<8x8x128xf32>,
    return
  }
  func.func @transform_0(%arg0: i32) -> (i32, i32) {
    %c0_i32 = arith.constant 0 : i32
    %c0_i32_0 = arith.constant 0 : i32
    return %arg0, %c0_i32 : i32, i32
  }
  func.func @transform_1(%arg0: i32) -> (i32, i32) {
    %c0_i32 = arith.constant 0 : i32
    %c0_i32_0 = arith.constant 0 : i32
    %c0_i32_1 = arith.constant 0 : i32
    return %c0_i32, %c0_i32_0 : i32, i32
  }
  func.func @transform_2(%arg0: i32) -> (i32, i32) {
    %c0_i32 = arith.constant 0 : i32
    %c0_i32_0 = arith.constant 0 : i32
    %c0_i32_1 = arith.constant 0 : i32
    return %c0_i32, %c0_i32_0 : i32, i32
  }
  func.func @transform_3(%arg0: i32) -> (i32, i32, i32) {
    %c0_i32 = arith.constant 0 : i32
    %c0_i32_0 = arith.constant 0 : i32
    %c0_i32_1 = arith.constant 0 : i32
    return %arg0, %c0_i32, %c0_i32_0 : i32, i32, i32
  }
}

</mosaic_0001>

<bundles_post_ra>
// kernel: tpu_custom_call.1
= control target key start
LH: loop header
LB: loop body
LE: loop exit
PB: predicated region body
PF: predicated region fallthrough
CT: control target
= control target key end

     0   :  { %8 = vsyncpa [#allocation3], 0  ;;  %s308_s0 = inlined_call_operand.hbm [shape: f32[8,8], index: 0, kind: input, shape index: {}]   ;;  %s309_s1 = inlined_call_operand.hbm [shape: f32[8,128], index: 1, kind: input, shape index: {}]   ;;  %s310_s2 = inlined_call_operand.hbm [shape: f32[8,128], index: 2, kind: input, shape index: {}]   ;;  %s311_s3 = inlined_call_operand.hbm [shape: f32[8,8,128], index: 3, kind: output, shape index: {}]  }
   0x1   :  { %9 = vsyncpa [#allocation6], 0  ;;  %s27_s14 = sshll.u32 %s309_s1, 4  ;;  %s28_s14 = int_to_ptr.hbm [resolvable:$true] %s27_s14 }
   0x2   :  { %10 = vsyncpa [#allocation4], 0  ;;  %s270_s15 = smov [#allocation5]   ;;  %s16_s19 = sshll.u32 %s308_s0, 4  ;;  %s17_s19 = int_to_ptr.hbm [resolvable:$true] %s16_s19 }
   0x3   :  { %s29_s16 = sshll.u32 %s270_s15, 4  ;;  %s271_s20 = smov [#allocation2]   ;;  %s30_s16 = int_to_ptr.vmem [resolvable:$true] %s29_s16 }
   0x4   :  { %32 = dma.hbm_to_vmem [thread:$0]  %s28_s14, 128, %s30_s16, [#allocation6]  }
   0x5   :  { %s18_s21 = sshll.u32 %s271_s20, 4  ;;  %s38_s24 = sshll.u32 %s310_s2, 4  ;;  %s19_s21 = int_to_ptr.vmem [resolvable:$true] %s18_s21  ;;  %s39_s24 = int_to_ptr.hbm [resolvable:$true] %s38_s24 }
   0x6   :  { %21 = dma.hbm_to_vmem [thread:$0]  %s17_s19, 128, %s19_s21, [#allocation3]  }
   0x7   :  { %s272_s1 = smov [#allocation7]  }
   0x8   :  { %s40_s25 = sshll.u32 %s272_s1, 4  ;;  %s41_s25 = int_to_ptr.vmem [resolvable:$true] %s40_s25 }
   0x9   :  { %43 = dma.hbm_to_vmem [thread:$0]  %s39_s24, 128, %s41_s25, [#allocation6]  }
   0xa   :  { %264 = dma.done.wait [#allocation3], 128  }
   0xb   :  { %265 = vsyncadd [#allocation3], 4294967168 }
   0xc   :  { %266 = dma.done.wait [#allocation6], 256  }
   0xd   :  { %267 = vsyncadd [#allocation6], 4294967040  ;;  %v60_v0 = vlaneseq  ;;  %v56_v2 = vld [vmem:[#allocation2] sm:$0xff]  ;;  %v57_v11 = vld [vmem:[#allocation5] sm:$0xff]  ;;  %s273_s0 = smov [#allocation8]   ;;  %s145_s28 = sshll.u32 %s311_s3, 4  ;;  %s146_s28 = int_to_ptr.hbm [resolvable:$true] %s145_s28 }
   0xe   :  { %v73_v3 = vperm.slane %v56_v2, 2  ;;  %v59_v4 = vperm.slane %v56_v2, 0  ;;  %v87_v5 = vperm.slane %v56_v2, 4  ;;  %v80_v6 = vperm.slane %v56_v2, 3  ;;  %v58_v14 = vld [vmem:[#allocation7] sm:$0xff]  ;;  %s143_s2 = sshll.u32 %s273_s0, 4  ;;  %s144_s2 = int_to_ptr.vmem [resolvable:$true] %s143_s2 }
   0xf   :  { %v61_v1 = vshrl.u32 %v60_v0, 7  ;;  %v66_v7 = vperm.slane %v56_v2, 1  ;;  %v94_v8 = vperm.slane %v56_v2, 5  ;;  %v108_v9 = vperm.slane %v56_v2, 7  ;;  %s274_s29 = smov 128   ;;  %s275_s30 = smov 8  }
  0x10   :  { %v101_v10 = vperm.slane %v56_v2, 6 }
  0x11   :  { %166 = vset.pattern.permute.xlu1 %v61_v1  ;;  %165 = vset.pattern.permute.xlu0 %v61_v1 }
  0x12   :  { %167 = vset.pattern.permute.xlu2 %v61_v1 }
  0x19   :  { %78 = vperm.xlu1 %166, %v73_v3   ;;  %64 = vperm.xlu0 %165, %v59_v4  }
  0x1a   :  { %92 = vperm.xlu2 %167, %v87_v5  }
  0x21   :  { %85 = vperm.xlu1 %166, %v80_v6   ;;  %71 = vperm.xlu0 %165, %v66_v7  }
  0x22   :  { %99 = vperm.xlu2 %167, %v94_v8  }
  0x29   :  { %113 = vperm.xlu1 %166, %v108_v9   ;;  %106 = vperm.xlu0 %165, %v101_v10  }
  0x74   :  { %v93_v12 = vpop.permute.xlu2 %92 }
  0x75   :  { %v119_v13 = vmul.f32 %v93_v12, %v57_v11 }
  0x77   :  { %v127_v15 = vadd.f32 %v119_v13, %v58_v14 }
  0x79   :  { %135 = vst [vmem:[#allocation8 + $0x20] sm:$0xff] %v127_v15 }
  0x7c   :  { %v100_v16 = vpop.permute.xlu2 %99 }
  0x7d   :  { %v120_v17 = vmul.f32 %v100_v16, %v57_v11 }
  0x7f   :  { %v128_v18 = vadd.f32 %v120_v17, %v58_v14 }
  0x81   :  { %136 = vst [vmem:[#allocation8 + $0x28] sm:$0xff] %v128_v18 }
  0x8b   :  { %v79_v19 = vpop.permute.xlu1 %78  ;;  %v65_v20 = vpop.permute.xlu0 %64 }
  0x8c   :  { %v117_v21 = vmul.f32 %v79_v19, %v57_v11  ;;  %v115_v22 = vmul.f32 %v65_v20, %v57_v11 }
  0x8e   :  { %v125_v23 = vadd.f32 %v117_v21, %v58_v14  ;;  %v123_v24 = vadd.f32 %v115_v22, %v58_v14 }
  0x90   :  { %133 = vst [vmem:[#allocation8 + $0x10] sm:$0xff] %v125_v23 }
  0x91   :  { %131 = vst [vmem:[#allocation8] sm:$0xff] %v123_v24 }
  0x93   :  { %v86_v25 = vpop.permute.xlu1 %85  ;;  %v72_v26 = vpop.permute.xlu0 %71 }
  0x94   :  { %v118_v27 = vmul.f32 %v86_v25, %v57_v11  ;;  %v116_v28 = vmul.f32 %v72_v26, %v57_v11 }
  0x96   :  { %v126_v29 = vadd.f32 %v118_v27, %v58_v14  ;;  %v124_v30 = vadd.f32 %v116_v28, %v58_v14 }
  0x98   :  { %134 = vst [vmem:[#allocation8 + $0x18] sm:$0xff] %v126_v29 }
  0x99   :  { %132 = vst [vmem:[#allocation8 + $0x8] sm:$0xff] %v124_v30 }
  0x9b   :  { %v114_v31 = vpop.permute.xlu1 %113  ;;  %v107_v32 = vpop.permute.xlu0 %106 }
  0x9c   :  { %v122_v33 = vmul.f32 %v114_v31, %v57_v11  ;;  %v121_v34 = vmul.f32 %v107_v32, %v57_v11 }
  0x9e   :  { %v130_v35 = vadd.f32 %v122_v33, %v58_v14  ;;  %v129_v36 = vadd.f32 %v121_v34, %v58_v14 }
  0xa0   :  { %138 = vst [vmem:[#allocation8 + $0x38] sm:$0xff] %v130_v35 }
  0xa1   :  { %137 = vst [vmem:[#allocation8 + $0x30] sm:$0xff] %v129_v36 }
  0xa2   :  { %151 = dma.vmem_to_hbm [thread:$0]  %s144_s2, 1024, %s146_s28, [#allocation4], %s274_s29, %s274_s29, %s275_s30  }
  0xa3   :  { %268 = dma.done.wait [#allocation4], 1024  }
  0xa4   :  { %269 = vsyncadd [#allocation4], 4294966272 }
  0xa5   :  { %156 = vsyncpa [#allocation3], 1 }
  0xa6   :  { %157 = vsyncpa [#allocation6], 1 }
  0xa7   :  { %158 = vsyncpa [#allocation4], 1 }

</bundles_post_ra>
